<compile_context>
chip_gen: v5e
topology: v5e:2x2
jax: 0.10.0
libtpu: 0.0.40
codegen_flags: <defaults>
</compile_context>

<pallas_src>
import jax
import jax.numpy as jnp
from jax.experimental import pallas as pl
from jax.experimental.pallas import tpu as pltpu


def _round_up(x, m):
    return (x + m - 1) // m * m


# ---------------------------------------------------------------------------
# Kernel
# ---------------------------------------------------------------------------
def _mlp_fused_kernel(x_ref, w1_ref, b1_ref, w2_ref, b2_ref, w3_ref, b3_ref,
                      o_ref, acc_ref):
    """fc1 (K-tiled accumulate) -> +b1 -> ReLU -> fc2 -> +b2 -> ReLU -> fc3 -> +b3.

    Grid = (batch tiles, K tiles).  acc_ref is a (tm, H1) f32 scratch that
    accumulates x @ W1 across the K axis; the tail layers run on the last K
    step only.  With a single K step this degenerates to the fully fused path.
    """
    k = pl.program_id(1)
    nk = pl.num_programs(1)

    @pl.when(k == 0)
    def _init():
        acc_ref[...] = jnp.zeros_like(acc_ref)

    w1 = w1_ref[...]
    # Cast activations to the (bf16) weight dtype in-register; accumulate f32.
    acc_ref[...] += jnp.dot(x_ref[...].astype(w1.dtype), w1,
                            preferred_element_type=jnp.float32)

    @pl.when(k == nk - 1)
    def _finish():
        w2 = w2_ref[...]
        w3 = w3_ref[...]
        h1 = jnp.maximum(acc_ref[...] + b1_ref[...], 0.0)          # f32 bias+ReLU
        h2 = jnp.dot(h1.astype(w2.dtype), w2,
                     preferred_element_type=jnp.float32) + b2_ref[...]
        h2 = jnp.maximum(h2, 0.0)
        o = jnp.dot(h2.astype(w3.dtype), w3,
                    preferred_element_type=jnp.float32) + b3_ref[...]
        o_ref[...] = o.astype(o_ref.dtype)


# ---------------------------------------------------------------------------
# Parameter init / one-time packing
# ---------------------------------------------------------------------------
def init_mlp_params(key, input_size, output_size):
    """torch.nn.Linear-style init (U[-1/sqrt(fan_in), 1/sqrt(fan_in)]).

    Weights stored as (in_features, out_features) so the kernel computes
    y = x @ W + b (transpose of torch's (out, in) storage).
    """
    dims = [(input_size, 64), (64, 30), (30, output_size)]
    params = []
    for fan_in, fan_out in dims:
        kw, kb, key = jax.random.split(key, 3)
        bound = 1.0 / jnp.sqrt(float(fan_in))
        w = jax.random.uniform(kw, (fan_in, fan_out), jnp.float32, -bound, bound)
        b = jax.random.uniform(kb, (fan_out,), jnp.float32, -bound, bound)
        params.append((w, b))
    return params


def pack_mlp_params(params, *, lane=128, weight_dtype=jnp.bfloat16):
    """One-time zero-pad to lane-aligned shapes; weights -> bf16, biases -> f32.

    Done once at setup, NOT per forward call, so no padding / cast traffic is
    paid in the forward pass.
    """
    packed = []
    for w, b in params:
        k, n = w.shape
        kp, np_ = _round_up(k, lane), _round_up(n, lane)
        wp = jnp.zeros((kp, np_), weight_dtype).at[:k, :n].set(w.astype(weight_dtype))
        bp = jnp.zeros((1, np_), jnp.float32).at[0, :n].set(b.astype(jnp.float32))
        packed.append((wp, bp))
    return packed


# ---------------------------------------------------------------------------
# Tile-size selection
# ---------------------------------------------------------------------------
def _tile_m_target():
    """(target batch tile, chip has >1 TensorCore)."""
    try:
        kind = jax.devices()[0].device_kind.lower()
    except Exception:  # pragma: no cover - conservative default
        return 256, False
    target = 128 if "v5" in kind else 256
    return target, ("v7" in kind)


def _choose_tm(B):
    target, multi_core = _tile_m_target()
    m8 = _round_up(max(B, 1), 8)
    tm = max(8, min(target, m8))
    if multi_core and tm > 8:
        # v7x: the "parallel" batch axis shards across the 2 TensorCores; make
        # sure it has at least 2 steps when the batch allows it.
        if _round_up(B, tm) // tm < 2 and m8 >= 16:
            tm = max(8, (m8 // 2) // 8 * 8)
    return tm


def _choose_tk(tm, Kp, H1, H2, Np, w_itemsize, budget):
    """Largest K tile (multiple of 128, dividing Kp) whose blocks fit `budget`."""
    lane = 128
    fixed = (H1 * 4 + H1 * H2 * w_itemsize          # b1, w2 (single buffered)
             + H2 * 4 + H2 * Np * w_itemsize        # b2, w3
             + Np * 4                               # b3
             + tm * Np * 4 * 2                      # output tiles (double buf)
             + tm * H1 * 4)                         # f32 accumulator scratch
    # Whole-K variant: x double buffered (f32), w1 single buffered (const idx).
    whole = fixed + tm * Kp * 4 * 2 + Kp * H1 * w_itemsize
    if whole <= budget:
        return Kp
    per_tile = tm * 4 * 2 + H1 * w_itemsize * 2     # x + w1, both double buffered
    avail = max(budget - fixed, per_tile * lane)
    tk = max(lane, (avail // per_tile) // lane * lane)
    tk = min(tk, Kp)
    # tk must divide Kp so no block reads past the padded arrays.
    q = Kp // lane
    d = min(tk // lane, q)
    while d > 1 and q % d != 0:
        d -= 1
    return d * lane


def _vmem_bytes(tm, tk, k_steps, H1, H2, Np, w_itemsize):
    w1_buf = 1 if k_steps == 1 else 2
    return (tm * tk * 4 * 2                     # x tiles (f32, double buffered)
            + tk * H1 * w_itemsize * w1_buf     # w1 tile(s)
            + H1 * 4 + H1 * H2 * w_itemsize     # b1, w2
            + H2 * 4 + H2 * Np * w_itemsize     # b2, w3
            + Np * 4                            # b3
            + tm * Np * 4 * 2                   # output tiles
            + tm * H1 * 4)                      # accumulator scratch


# ---------------------------------------------------------------------------
# Forward
# ---------------------------------------------------------------------------
_SINGLE_BUFFER_WEIGHTS = None  # lazily resolved: does pl.Buffered(1) compile here?


def _make_spec(block_shape, index_map, single_buffer):
    if single_buffer:
        # Constant-index blocks never change between grid steps; single-buffer
        # them to halve their VMEM footprint (matters most on v7x's 64 MiB).
        return pl.BlockSpec(block_shape, index_map, pipeline_mode=pl.Buffered(1))
    return pl.BlockSpec(block_shape, index_map)


def mlp_forward_pallas(packed_params, x_raw, output_size, *, tm=None,
                       vmem_budget_bytes=20 * 1024 * 1024):
    """Fused Pallas forward: flatten -> fc1 -> ReLU -> fc2 -> ReLU -> fc3."""
    global _SINGLE_BUFFER_WEIGHTS

    (w1, b1), (w2, b2), (w3, b3) = packed_params
    Kp, H1 = w1.shape
    H2 = w2.shape[1]
    Np = w3.shape[1]
    w_itemsize = jnp.dtype(w1.dtype).itemsize

    B = x_raw.shape[0]
    x = x_raw.reshape(B, -1).astype(jnp.float32)   # matches torch x.view(B, -1)
    K = x.shape[1]
    assert K <= Kp, (K, Kp)

    if tm is None:
        tm = _choose_tm(B)
    tm = max(8, (tm // 8) * 8)
    Mp = _round_up(B, tm)

    tk = _choose_tk(tm, Kp, H1, H2, Np, w_itemsize, vmem_budget_bytes)
    k_steps = Kp // tk

    # Only the (small) activation tensor may need per-call padding; skip the
    # extra HBM copy entirely when shapes are already tile-aligned (prefer
    # batch sizes that are multiples of tm for large-B serving).
    if (Mp, Kp) != (B, K):
        xp = jnp.zeros((Mp, Kp), x.dtype).at[:B, :K].set(x)
    else:
        xp = x

    total_vmem = _vmem_bytes(tm, tk, k_steps, H1, H2, Np, w_itemsize)
    vmem_limit = int(min(max(total_vmem * 3 // 2 + (4 << 20), 32 << 20), 64 << 20))

    grid = (Mp // tm, k_steps)

    def _call(single_buffer):
        if k_steps == 1:
            w1_spec = _make_spec((Kp, H1), lambda i, k: (0, 0), single_buffer)
        else:
            # K-tiled w1 changes block index each step -> keep double buffering.
            w1_spec = pl.BlockSpec((tk, H1), lambda i, k: (k, 0))
        return pl.pallas_call(
            _mlp_fused_kernel,
            out_shape=jax.ShapeDtypeStruct((Mp, Np), jnp.float32),
            grid_spec=pltpu.PrefetchScalarGridSpec(
                num_scalar_prefetch=0,
                grid=grid,
                in_specs=[
                    pl.BlockSpec((tm, tk), lambda i, k: (i, k)),            # x
                    w1_spec,                                                # w1
                    _make_spec((1, H1), lambda i, k: (0, 0), single_buffer),   # b1
                    _make_spec((H1, H2), lambda i, k: (0, 0), single_buffer),  # w2
                    _make_spec((1, H2), lambda i, k: (0, 0), single_buffer),   # b2
                    _make_spec((H2, Np), lambda i, k: (0, 0), single_buffer),  # w3
                    _make_spec((1, Np), lambda i, k: (0, 0), single_buffer),   # b3
                ],
                out_specs=pl.BlockSpec((tm, Np), lambda i, k: (i, 0)),
                scratch_shapes=[pltpu.VMEM((tm, H1), jnp.float32)],
            ),
            compiler_params=pltpu.CompilerParams(
                dimension_semantics=("parallel", "arbitrary"),
                vmem_limit_bytes=vmem_limit,
            ),
        )(xp, w1, b1, w2, b2, w3, b3)

    attempts = ([True, False] if _SINGLE_BUFFER_WEIGHTS is None
                else [_SINGLE_BUFFER_WEIGHTS])
    out, last_err = None, None
    for single_buffer in attempts:
        try:
            out = jax.block_until_ready(_call(single_buffer))
            _SINGLE_BUFFER_WEIGHTS = single_buffer
            break
        except Exception as e:  # fall back to default double buffering once
            last_err = e
            out = None
    if out is None:
        raise last_err

    return out[:B, :output_size]


# ---------------------------------------------------------------------------
# Reference + demo
# ---------------------------------------------------------------------------
def mlp_reference(params, x_raw):
    """Plain-JAX f32 reference for verification (unpadded params)."""
    B = x_raw.shape[0]
    x = x_raw.reshape(B, -1)
    (w1, b1), (w2, b2), (w3, b3) = params
    x = jnp.maximum(x @ w1 + b1, 0.0)
    x = jnp.maximum(x @ w2 + b2, 0.0)
    return x @ w3 + b3


if __name__ == "__main__":
    key = jax.random.PRNGKey(0)
    k_params, k_x, k_x2 = jax.random.split(key, 3)

    # Small shapes consistent with the module: flatten([2, 4, 16, 16]) -> 1024
    B, C, H, W = 2, 4, 16, 16
    input_size = C * H * W      # 1024
    output_size = 10

    params = init_mlp_params(k_params, input_size, output_size)
    packed = pack_mlp_params(params)   # one-time pad + bf16 cast, reused forever

    # bf16 weights with f32 accumulate -> relaxed tolerance vs pure-f32 reference.
    atol = rtol = 5e-2

    x = jax.random.normal(k_x, (B, C, H, W), jnp.float32)
    out = jax.block_until_ready(mlp_forward_pallas(packed, x, output_size))
    ref = mlp_reference(params, x)
    assert out.shape == (B, output_size), out.shape
    err = float(jnp.max(jnp.abs(out - ref)))
    assert jnp.allclose(out, ref, atol=atol, rtol=rtol), f"max abs err {err}"

    # Second (still small) batch exercises multi-row tiles and the row-padding path.
    B2 = 13
    x2 = jax.random.normal(k_x2, (B2, C, H, W), jnp.float32)
    out2 = jax.block_until_ready(mlp_forward_pallas(packed, x2, output_size))
    ref2 = mlp_reference(params, x2)
    assert out2.shape == (B2, output_size), out2.shape
    err2 = float(jnp.max(jnp.abs(out2 - ref2)))
    assert jnp.allclose(out2, ref2, atol=atol, rtol=rtol), f"max abs err {err2}"

    print("KERNEL_OK")
</pallas_src>

<mosaic_0001>
module attributes {stable_mosaic.version = 11 : i64} {
  func.func @_mlp_fused_kernel(%arg0: i32, %arg1: i32, %arg2: memref<8x1024xf32, #tpu.memory_space<vmem>>, %arg3: memref<1024x128xbf16, #tpu.memory_space<vmem>>, %arg4: memref<1x128xf32, #tpu.memory_space<vmem>>, %arg5: memref<128x128xbf16, #tpu.memory_space<vmem>>, %arg6: memref<1x128xf32, #tpu.memory_space<vmem>>, %arg7: memref<128x128xbf16, #tpu.memory_space<vmem>>, %arg8: memref<1x128xf32, #tpu.memory_space<vmem>>, %arg9: memref<8x128xf32, #tpu.memory_space<vmem>>, %arg10: memref<8x128xf32, #tpu.memory_space<vmem>>) attributes {dimension_semantics = [#tpu.dimension_semantics<parallel>, #tpu.dimension_semantics<arbitrary>], iteration_bounds = array<i64: 1, 1>, scalar_prefetch = 0 : i64, scratch_operands = 1 : i64, tpu.core_type = #tpu.core_type<tc>, window_params = [{transform_indices = @transform_0, window_bounds = array<i64: 8, 1024>}, {pipeline_mode = #tpu.pipeline_mode<synchronous>, transform_indices = @transform_1, window_bounds = array<i64: 1024, 128>}, {pipeline_mode = #tpu.pipeline_mode<synchronous>, transform_indices = @transform_2, window_bounds = array<i64: 1, 128>}, {pipeline_mode = #tpu.pipeline_mode<synchronous>, transform_indices = @transform_3, window_bounds = array<i64: 128, 128>}, {pipeline_mode = #tpu.pipeline_mode<synchronous>, transform_indices = @transform_4, window_bounds = array<i64: 1, 128>}, {pipeline_mode = #tpu.pipeline_mode<synchronous>, transform_indices = @transform_5, window_bounds = array<i64: 128, 128>}, {pipeline_mode = #tpu.pipeline_mode<synchronous>, transform_indices = @transform_6, window_bounds = array<i64: 1, 128>}, {transform_indices = @transform_7, window_bounds = array<i64: 8, 128>}]} {
    %c0_i32 = arith.constant 0 : i32
    %0 = arith.cmpi eq, %arg1, %c0_i32 : i32
    %1 = arith.extui %0 : i1 to i32
    %c0_i32_0 = arith.constant 0 : i32
    %2 = arith.cmpi ne, %1, %c0_i32_0 : i32
    scf.if %2 {
      %cst_10 = arith.constant 0.000000e+00 : f32
      %13 = vector.broadcast %cst_10 : f32 to vector<8x128xf32>
      %c0_11 = arith.constant 0 : index
      %c0_12 = arith.constant 0 : index
      %14 = vector.load %arg10[%c0_11, %c0_12] : memref<8x128xf32, #tpu.memory_space<vmem>>, vector<8x128xf32>
      tpu.vector_store %arg10[%c0_11, %c0_12], %13 {strides = array<i32>} : memref<8x128xf32, #tpu.memory_space<vmem>>, vector<8x128xf32>,
    } else {
    }
    %c0 = arith.constant 0 : index
    %c0_1 = arith.constant 0 : index
    %3 = vector.load %arg3[%c0, %c0_1] : memref<1024x128xbf16, #tpu.memory_space<vmem>>, vector<1024x128xbf16>
    %c0_2 = arith.constant 0 : index
    %c0_3 = arith.constant 0 : index
    %4 = vector.load %arg10[%c0_2, %c0_3] : memref<8x128xf32, #tpu.memory_space<vmem>>, vector<8x128xf32>
    %c0_4 = arith.constant 0 : index
    %c0_5 = arith.constant 0 : index
    %5 = vector.load %arg2[%c0_4, %c0_5] : memref<8x1024xf32, #tpu.memory_space<vmem>>, vector<8x1024xf32>
    %6 = arith.truncf %5 : vector<8x1024xf32> to vector<8x1024xbf16>
    %cst = arith.constant dense<0.000000e+00> : vector<8x128xf32>
    %7 = tpu.matmul %6, %3, %cst {dimension_numbers = #tpu.dot_dimension_numbers<[1], [0], [0], [1], [0, 0, 1, 1], [], []>} : vector<8x1024xbf16>, vector<1024x128xbf16>, vector<8x128xf32> -> vector<8x128xf32>
    %8 = arith.addf %4, %7 : vector<8x128xf32>
    %c0_6 = arith.constant 0 : index
    %c0_7 = arith.constant 0 : index
    %9 = vector.load %arg10[%c0_6, %c0_7] : memref<8x128xf32, #tpu.memory_space<vmem>>, vector<8x128xf32>
    tpu.vector_store %arg10[%c0_6, %c0_7], %8 {strides = array<i32>} : memref<8x128xf32, #tpu.memory_space<vmem>>, vector<8x128xf32>,
    %c0_i32_8 = arith.constant 0 : i32
    %10 = arith.cmpi eq, %arg1, %c0_i32_8 : i32
    %11 = arith.extui %10 : i1 to i32
    %c0_i32_9 = arith.constant 0 : i32
    %12 = arith.cmpi ne, %11, %c0_i32_9 : i32
    scf.if %12 {
      %c0_10 = arith.constant 0 : index
      %c0_11 = arith.constant 0 : index
      %13 = vector.load %arg5[%c0_10, %c0_11] : memref<128x128xbf16, #tpu.memory_space<vmem>>, vector<128x128xbf16>
      %c0_12 = arith.constant 0 : index
      %c0_13 = arith.constant 0 : index
      %14 = vector.load %arg7[%c0_12, %c0_13] : memref<128x128xbf16, #tpu.memory_space<vmem>>, vector<128x128xbf16>
      %c0_14 = arith.constant 0 : index
      %c0_15 = arith.constant 0 : index
      %15 = vector.load %arg10[%c0_14, %c0_15] : memref<8x128xf32, #tpu.memory_space<vmem>>, vector<8x128xf32>
      %c0_16 = arith.constant 0 : index
      %c0_17 = arith.constant 0 : index
      %16 = vector.load %arg4[%c0_16, %c0_17] : memref<1x128xf32, #tpu.memory_space<vmem>>, vector<1x128xf32>
      %17 = vector.broadcast %16 : vector<1x128xf32> to vector<8x128xf32>
      %18 = arith.addf %15, %17 : vector<8x128xf32>
      %cst_18 = arith.constant 0.000000e+00 : f32
      %19 = vector.broadcast %cst_18 : f32 to vector<8x128xf32>
      %20 = arith.maximumf %18, %19 : vector<8x128xf32>
      %21 = arith.truncf %20 : vector<8x128xf32> to vector<8x128xbf16>
      %cst_19 = arith.constant dense<0.000000e+00> : vector<8x128xf32>
      %22 = tpu.matmul %21, %13, %cst_19 {dimension_numbers = #tpu.dot_dimension_numbers<[1], [0], [0], [1], [0, 0, 1, 1], [], []>} : vector<8x128xbf16>, vector<128x128xbf16>, vector<8x128xf32> -> vector<8x128xf32>
      %c0_20 = arith.constant 0 : index
      %c0_21 = arith.constant 0 : index
      %23 = vector.load %arg6[%c0_20, %c0_21] : memref<1x128xf32, #tpu.memory_space<vmem>>, vector<1x128xf32>
      %24 = vector.broadcast %23 : vector<1x128xf32> to vector<8x128xf32>
      %25 = arith.addf %22, %24 : vector<8x128xf32>
      %cst_22 = arith.constant 0.000000e+00 : f32
      %26 = vector.broadcast %cst_22 : f32 to vector<8x128xf32>
      %27 = arith.maximumf %25, %26 : vector<8x128xf32>
      %28 = arith.truncf %27 : vector<8x128xf32> to vector<8x128xbf16>
      %cst_23 = arith.constant dense<0.000000e+00> : vector<8x128xf32>
      %29 = tpu.matmul %28, %14, %cst_23 {dimension_numbers = #tpu.dot_dimension_numbers<[1], [0], [0], [1], [0, 0, 1, 1], [], []>} : vector<8x128xbf16>, vector<128x128xbf16>, vector<8x128xf32> -> vector<8x128xf32>
      %c0_24 = arith.constant 0 : index
      %c0_25 = arith.constant 0 : index
      %30 = vector.load %arg8[%c0_24, %c0_25] : memref<1x128xf32, #tpu.memory_space<vmem>>, vector<1x128xf32>
      %31 = vector.broadcast %30 : vector<1x128xf32> to vector<8x128xf32>
      %32 = arith.addf %29, %31 : vector<8x128xf32>
      %c0_26 = arith.constant 0 : index
      %c0_27 = arith.constant 0 : index
      %33 = vector.load %arg9[%c0_26, %c0_27] : memref<8x128xf32, #tpu.memory_space<vmem>>, vector<8x128xf32>
      tpu.vector_store %arg9[%c0_26, %c0_27], %32 {strides = array<i32>} : memref<8x128xf32, #tpu.memory_space<vmem>>, vector<8x128xf32>,
    } else {
    }
    return
  }
  func.func @transform_0(%arg0: i32, %arg1: i32) -> (i32, i32) {
    %c0_i32 = arith.constant 0 : i32
    return %arg0, %arg1 : i32, i32
  }
  func.func @transform_1(%arg0: i32, %arg1: i32) -> (i32, i32) {
    %c0_i32 = arith.constant 0 : i32
    %c0_i32_0 = arith.constant 0 : i32
    %c0_i32_1 = arith.constant 0 : i32
    return %c0_i32, %c0_i32_0 : i32, i32
  }
  func.func @transform_2(%arg0: i32, %arg1: i32) -> (i32, i32) {
    %c0_i32 = arith.constant 0 : i32
    %c0_i32_0 = arith.constant 0 : i32
    %c0_i32_1 = arith.constant 0 : i32
    return %c0_i32, %c0_i32_0 : i32, i32
  }
  func.func @transform_3(%arg0: i32, %arg1: i32) -> (i32, i32) {
    %c0_i32 = arith.constant 0 : i32
    %c0_i32_0 = arith.constant 0 : i32
    %c0_i32_1 = arith.constant 0 : i32
    return %c0_i32, %c0_i32_0 : i32, i32
  }
  func.func @transform_4(%arg0: i32, %arg1: i32) -> (i32, i32) {
    %c0_i32 = arith.constant 0 : i32
    %c0_i32_0 = arith.constant 0 : i32
    %c0_i32_1 = arith.constant 0 : i32
    return %c0_i32, %c0_i32_0 : i32, i32
  }
  func.func @transform_5(%arg0: i32, %arg1: i32) -> (i32, i32) {
    %c0_i32 = arith.constant 0 : i32
    %c0_i32_0 = arith.constant 0 : i32
    %c0_i32_1 = arith.constant 0 : i32
    return %c0_i32, %c0_i32_0 : i32, i32
  }
  func.func @transform_6(%arg0: i32, %arg1: i32) -> (i32, i32) {
    %c0_i32 = arith.constant 0 : i32
    %c0_i32_0 = arith.constant 0 : i32
    %c0_i32_1 = arith.constant 0 : i32
    return %c0_i32, %c0_i32_0 : i32, i32
  }
  func.func @transform_7(%arg0: i32, %arg1: i32) -> (i32, i32) {
    %c0_i32 = arith.constant 0 : i32
    %c0_i32_0 = arith.constant 0 : i32
    return %arg0, %c0_i32 : i32, i32
  }
}

module attributes {stable_mosaic.version = 11 : i64} {
  func.func @_mlp_fused_kernel(%arg0: i32, %arg1: i32, %arg2: memref<8x1024xf32, #tpu.memory_space<vmem>>, %arg3: memref<1024x128xbf16, #tpu.memory_space<vmem>>, %arg4: memref<1x128xf32, #tpu.memory_space<vmem>>, %arg5: memref<128x128xbf16, #tpu.memory_space<vmem>>, %arg6: memref<1x128xf32, #tpu.memory_space<vmem>>, %arg7: memref<128x128xbf16, #tpu.memory_space<vmem>>, %arg8: memref<1x128xf32, #tpu.memory_space<vmem>>, %arg9: memref<8x128xf32, #tpu.memory_space<vmem>>, %arg10: memref<8x128xf32, #tpu.memory_space<vmem>>) attributes {dimension_semantics = [#tpu.dimension_semantics<parallel>, #tpu.dimension_semantics<arbitrary>], iteration_bounds = array<i64: 1, 1>, scalar_prefetch = 0 : i64, scratch_operands = 1 : i64, tpu.core_type = #tpu.core_type<tc>, window_params = [{transform_indices = @transform_0, window_bounds = array<i64: 8, 1024>}, {pipeline_mode = #tpu.pipeline_mode<synchronous>, transform_indices = @transform_1, window_bounds = array<i64: 1024, 128>}, {pipeline_mode = #tpu.pipeline_mode<synchronous>, transform_indices = @transform_2, window_bounds = array<i64: 1, 128>}, {pipeline_mode = #tpu.pipeline_mode<synchronous>, transform_indices = @transform_3, window_bounds = array<i64: 128, 128>}, {pipeline_mode = #tpu.pipeline_mode<synchronous>, transform_indices = @transform_4, window_bounds = array<i64: 1, 128>}, {pipeline_mode = #tpu.pipeline_mode<synchronous>, transform_indices = @transform_5, window_bounds = array<i64: 128, 128>}, {pipeline_mode = #tpu.pipeline_mode<synchronous>, transform_indices = @transform_6, window_bounds = array<i64: 1, 128>}, {transform_indices = @transform_7, window_bounds = array<i64: 8, 128>}]} {
    %c0_i32 = arith.constant 0 : i32
    %0 = arith.cmpi eq, %arg1, %c0_i32 : i32
    %1 = arith.extui %0 : i1 to i32
    %c0_i32_0 = arith.constant 0 : i32
    %2 = arith.cmpi ne, %1, %c0_i32_0 : i32
    scf.if %2 {
      %cst_10 = arith.constant 0.000000e+00 : f32
      %13 = vector.broadcast %cst_10 : f32 to vector<8x128xf32>
      %c0_11 = arith.constant 0 : index
      %c0_12 = arith.constant 0 : index
      %14 = vector.load %arg10[%c0_11, %c0_12] : memref<8x128xf32, #tpu.memory_space<vmem>>, vector<8x128xf32>
      tpu.vector_store %arg10[%c0_11, %c0_12], %13 {strides = array<i32>} : memref<8x128xf32, #tpu.memory_space<vmem>>, vector<8x128xf32>,
    } else {
    }
    %c0 = arith.constant 0 : index
    %c0_1 = arith.constant 0 : index
    %3 = vector.load %arg3[%c0, %c0_1] : memref<1024x128xbf16, #tpu.memory_space<vmem>>, vector<1024x128xbf16>
    %c0_2 = arith.constant 0 : index
    %c0_3 = arith.constant 0 : index
    %4 = vector.load %arg10[%c0_2, %c0_3] : memref<8x128xf32, #tpu.memory_space<vmem>>, vector<8x128xf32>
    %c0_4 = arith.constant 0 : index
    %c0_5 = arith.constant 0 : index
    %5 = vector.load %arg2[%c0_4, %c0_5] : memref<8x1024xf32, #tpu.memory_space<vmem>>, vector<8x1024xf32>
    %6 = arith.truncf %5 : vector<8x1024xf32> to vector<8x1024xbf16>
    %cst = arith.constant dense<0.000000e+00> : vector<8x128xf32>
    %7 = tpu.matmul %6, %3, %cst {dimension_numbers = #tpu.dot_dimension_numbers<[1], [0], [0], [1], [0, 0, 1, 1], [], []>} : vector<8x1024xbf16>, vector<1024x128xbf16>, vector<8x128xf32> -> vector<8x128xf32>
    %8 = arith.addf %4, %7 : vector<8x128xf32>
    %c0_6 = arith.constant 0 : index
    %c0_7 = arith.constant 0 : index
    %9 = vector.load %arg10[%c0_6, %c0_7] : memref<8x128xf32, #tpu.memory_space<vmem>>, vector<8x128xf32>
    tpu.vector_store %arg10[%c0_6, %c0_7], %8 {strides = array<i32>} : memref<8x128xf32, #tpu.memory_space<vmem>>, vector<8x128xf32>,
    %c0_i32_8 = arith.constant 0 : i32
    %10 = arith.cmpi eq, %arg1, %c0_i32_8 : i32
    %11 = arith.extui %10 : i1 to i32
    %c0_i32_9 = arith.constant 0 : i32
    %12 = arith.cmpi ne, %11, %c0_i32_9 : i32
    scf.if %12 {
      %c0_10 = arith.constant 0 : index
      %c0_11 = arith.constant 0 : index
      %13 = vector.load %arg5[%c0_10, %c0_11] : memref<128x128xbf16, #tpu.memory_space<vmem>>, vector<128x128xbf16>
      %c0_12 = arith.constant 0 : index
      %c0_13 = arith.constant 0 : index
      %14 = vector.load %arg7[%c0_12, %c0_13] : memref<128x128xbf16, #tpu.memory_space<vmem>>, vector<128x128xbf16>
      %c0_14 = arith.constant 0 : index
      %c0_15 = arith.constant 0 : index
      %15 = vector.load %arg10[%c0_14, %c0_15] : memref<8x128xf32, #tpu.memory_space<vmem>>, vector<8x128xf32>
      %c0_16 = arith.constant 0 : index
      %c0_17 = arith.constant 0 : index
      %16 = vector.load %arg4[%c0_16, %c0_17] : memref<1x128xf32, #tpu.memory_space<vmem>>, vector<1x128xf32>
      %17 = vector.broadcast %16 : vector<1x128xf32> to vector<8x128xf32>
      %18 = arith.addf %15, %17 : vector<8x128xf32>
      %cst_18 = arith.constant 0.000000e+00 : f32
      %19 = vector.broadcast %cst_18 : f32 to vector<8x128xf32>
      %20 = arith.maximumf %18, %19 : vector<8x128xf32>
      %21 = arith.truncf %20 : vector<8x128xf32> to vector<8x128xbf16>
      %cst_19 = arith.constant dense<0.000000e+00> : vector<8x128xf32>
      %22 = tpu.matmul %21, %13, %cst_19 {dimension_numbers = #tpu.dot_dimension_numbers<[1], [0], [0], [1], [0, 0, 1, 1], [], []>} : vector<8x128xbf16>, vector<128x128xbf16>, vector<8x128xf32> -> vector<8x128xf32>
      %c0_20 = arith.constant 0 : index
      %c0_21 = arith.constant 0 : index
      %23 = vector.load %arg6[%c0_20, %c0_21] : memref<1x128xf32, #tpu.memory_space<vmem>>, vector<1x128xf32>
      %24 = vector.broadcast %23 : vector<1x128xf32> to vector<8x128xf32>
      %25 = arith.addf %22, %24 : vector<8x128xf32>
      %cst_22 = arith.constant 0.000000e+00 : f32
      %26 = vector.broadcast %cst_22 : f32 to vector<8x128xf32>
      %27 = arith.maximumf %25, %26 : vector<8x128xf32>
      %28 = arith.truncf %27 : vector<8x128xf32> to vector<8x128xbf16>
      %cst_23 = arith.constant dense<0.000000e+00> : vector<8x128xf32>
      %29 = tpu.matmul %28, %14, %cst_23 {dimension_numbers = #tpu.dot_dimension_numbers<[1], [0], [0], [1], [0, 0, 1, 1], [], []>} : vector<8x128xbf16>, vector<128x128xbf16>, vector<8x128xf32> -> vector<8x128xf32>
      %c0_24 = arith.constant 0 : index
      %c0_25 = arith.constant 0 : index
      %30 = vector.load %arg8[%c0_24, %c0_25] : memref<1x128xf32, #tpu.memory_space<vmem>>, vector<1x128xf32>
      %31 = vector.broadcast %30 : vector<1x128xf32> to vector<8x128xf32>
      %32 = arith.addf %29, %31 : vector<8x128xf32>
      %c0_26 = arith.constant 0 : index
      %c0_27 = arith.constant 0 : index
      %33 = vector.load %arg9[%c0_26, %c0_27] : memref<8x128xf32, #tpu.memory_space<vmem>>, vector<8x128xf32>
      tpu.vector_store %arg9[%c0_26, %c0_27], %32 {strides = array<i32>} : memref<8x128xf32, #tpu.memory_space<vmem>>, vector<8x128xf32>,
    } else {
    }
    return
  }
  func.func @transform_0(%arg0: i32, %arg1: i32) -> (i32, i32) {
    %c0_i32 = arith.constant 0 : i32
    return %arg0, %arg1 : i32, i32
  }
  func.func @transform_1(%arg0: i32, %arg1: i32) -> (i32, i32) {
    %c0_i32 = arith.constant 0 : i32
    %c0_i32_0 = arith.constant 0 : i32
    %c0_i32_1 = arith.constant 0 : i32
    return %c0_i32, %c0_i32_0 : i32, i32
  }
  func.func @transform_2(%arg0: i32, %arg1: i32) -> (i32, i32) {
    %c0_i32 = arith.constant 0 : i32
    %c0_i32_0 = arith.constant 0 : i32
    %c0_i32_1 = arith.constant 0 : i32
    return %c0_i32, %c0_i32_0 : i32, i32
  }
  func.func @transform_3(%arg0: i32, %arg1: i32) -> (i32, i32) {
    %c0_i32 = arith.constant 0 : i32
    %c0_i32_0 = arith.constant 0 : i32
    %c0_i32_1 = arith.constant 0 : i32
    return %c0_i32, %c0_i32_0 : i32, i32
  }
  func.func @transform_4(%arg0: i32, %arg1: i32) -> (i32, i32) {
    %c0_i32 = arith.constant 0 : i32
    %c0_i32_0 = arith.constant 0 : i32
    %c0_i32_1 = arith.constant 0 : i32
    return %c0_i32, %c0_i32_0 : i32, i32
  }
  func.func @transform_5(%arg0: i32, %arg1: i32) -> (i32, i32) {
    %c0_i32 = arith.constant 0 : i32
    %c0_i32_0 = arith.constant 0 : i32
    %c0_i32_1 = arith.constant 0 : i32
    return %c0_i32, %c0_i32_0 : i32, i32
  }
  func.func @transform_6(%arg0: i32, %arg1: i32) -> (i32, i32) {
    %c0_i32 = arith.constant 0 : i32
    %c0_i32_0 = arith.constant 0 : i32
    %c0_i32_1 = arith.constant 0 : i32
    return %c0_i32, %c0_i32_0 : i32, i32
  }
  func.func @transform_7(%arg0: i32, %arg1: i32) -> (i32, i32) {
    %c0_i32 = arith.constant 0 : i32
    %c0_i32_0 = arith.constant 0 : i32
    return %arg0, %c0_i32 : i32, i32
  }
}

</mosaic_0001>

<bundles_post_ra>
// kernel: tpu_custom_call.1
= control target key start
LH: loop header
LB: loop body
LE: loop exit
PB: predicated region body
PF: predicated region fallthrough
CT: control target
= control target key end

     0   :  { %12 = vsyncpa [#allocation4], 0  ;;  %s1532_s0 = inlined_call_operand.hbm [shape: f32[8,1024], index: 0, kind: input, shape index: {}]   ;;  %s1533_s1 = inlined_call_operand.hbm [shape: bf16[1024,128], index: 1, kind: input, shape index: {}]   ;;  %s1534_s2 = inlined_call_operand.vmem [shape: f32[1,128], index: 2, kind: input, shape index: {}]   ;;  %s1535_s3 = inlined_call_operand.hbm [shape: bf16[128,128], index: 3, kind: input, shape index: {}]   ;;  %s1536_s4 = inlined_call_operand.vmem [shape: f32[1,128], index: 4, kind: input, shape index: {}]   ;;  %s1537_s5 = inlined_call_operand.hbm [shape: bf16[128,128], index: 5, kind: input, shape index: {}]   ;;  %s1538_s6 = inlined_call_operand.vmem [shape: f32[1,128], index: 6, kind: input, shape index: {}]   ;;  %s1539_s7 = inlined_call_operand.hbm [shape: f32[8,128], index: 7, kind: output, shape index: {}]  }
   0x1   :  { %13 = vsyncpa [#allocation7], 0 }
   0x2   :  { %14 = vsyncpa [#allocation10], 0  ;;  %s31_s26 = sshll.u32 %s1533_s1, 4  ;;  %s32_s26 = int_to_ptr.hbm [resolvable:$true] %s31_s26 }
   0x3   :  { %15 = vsyncpa [#allocation5], 0  ;;  %s1461_s27 = smov [#allocation6]   ;;  %s21_s8 = sshll.u32 %s1532_s0, 4  ;;  %s22_s8 = int_to_ptr.hbm [resolvable:$true] %s21_s8 }
   0x4   :  { %s33_s28 = sshll.u32 %s1461_s27, 4  ;;  %s1462_s9 = smov 64   ;;  %s34_s28 = int_to_ptr.vmem [resolvable:$true] %s33_s28 }
   0x5   :  { %s1463_s10 = smov 4   ;;  %s1464_s11 = smov [#allocation3]  }
   0x6   :  { %39 = dma.hbm_to_vmem [thread:$0]  %s32_s26, 8192, %s34_s28, [#allocation7], %s1462_s9, %s1462_s9, %s1463_s10  }
   0x7   :  { %s23_s12 = sshll.u32 %s1464_s11, 4  ;;  %s46_s15 = sshll.u32 %s1535_s3, 4  ;;  %s24_s12 = int_to_ptr.vmem [resolvable:$true] %s23_s12  ;;  %s47_s15 = int_to_ptr.hbm [resolvable:$true] %s46_s15 }
   0x8   :  { %26 = dma.hbm_to_vmem [thread:$0]  %s22_s8, 1024, %s24_s12, [#allocation4]  }
   0x9   :  { %s61_s17 = sshll.u32 %s1537_s5, 4  ;;  %s1465_s18 = smov [#allocation8]   ;;  %s62_s17 = int_to_ptr.hbm [resolvable:$true] %s61_s17 }
   0xa   :  { %s48_s19 = sshll.u32 %s1465_s18, 4  ;;  %s1466_s0 = smov [#allocation9]   ;;  %s49_s19 = int_to_ptr.vmem [resolvable:$true] %s48_s19 }
   0xb   :  { %54 = dma.hbm_to_vmem [thread:$0]  %s47_s15, 1024, %s49_s19, [#allocation7], %s1462_s9, %s1462_s9, %s1463_s10  }
   0xc   :  { %s63_s20 = sshll.u32 %s1466_s0, 4  ;;  %s64_s20 = int_to_ptr.vmem [resolvable:$true] %s63_s20 }
   0xd   :  { %69 = dma.hbm_to_vmem [thread:$0]  %s62_s17, 1024, %s64_s20, [#allocation10], %s1462_s9, %s1462_s9, %s1463_s10  }
   0xe   :  { %1453 = dma.done.wait [#allocation4], 1024  }
   0xf   :  { %1454 = vsyncadd [#allocation4], 4294966272 }
  0x10   :  { %1455 = dma.done.wait [#allocation7], 9216  }
  0x11   :  { %1456 = vsyncadd [#allocation7], 4294958080 }
  0x12   :  { %1457 = dma.done.wait [#allocation10], 1024  }
  0x13   :  { %1458 = vsyncadd [#allocation10], 4294966272  ;;  %v1250_v0 = vld [vmem:[#allocation6 + $0x38] sm:$0xff]  ;;  %v1249_v4 = vld [vmem:[#allocation6 + $0x30] sm:$0xff]  ;;  %s1467_s24 = smov [#allocation11]   ;;  %s911_s28 = sshll.u32 %s1539_s7, 4  ;;  %s912_s28 = int_to_ptr.hbm [resolvable:$true] %s911_s28 }
  0x14   :  { %v1258_v1 = vld [vmem:[#allocation6 + $0x78] sm:$0xff]  ;;  %622 = vmatpush.bf16.msra.mxu0 %v1250_v0  ;;  %v1257_v5 = vld [vmem:[#allocation6 + $0x70] sm:$0xff]  ;;  %v1248_v8 = vld [vmem:[#allocation6 + $0x28] sm:$0xff]  ;;  %s909_s25 = sshll.u32 %s1467_s24, 4  ;;  %s910_s25 = int_to_ptr.vmem [resolvable:$true] %s909_s25 }
  0x15   :  { %v1266_v2 = vld [vmem:[#allocation6 + $0xb8] sm:$0xff]  ;;  %635 = vmatpush.bf16.msra.mxu1 %v1258_v1  ;;  %v1265_v6 = vld [vmem:[#allocation6 + $0xb0] sm:$0xff]  ;;  %v1256_v9 = vld [vmem:[#allocation6 + $0x68] sm:$0xff] }
  0x16   :  { %v1274_v3 = vld [vmem:[#allocation6 + $0xf8] sm:$0xff]  ;;  %648 = vmatpush.bf16.msra.mxu2 %v1266_v2  ;;  %v1273_v7 = vld [vmem:[#allocation6 + $0xf0] sm:$0xff]  ;;  %v1264_v10 = vld [vmem:[#allocation6 + $0xa8] sm:$0xff] }
  0x17   :  { %661 = vmatpush.bf16.msra.mxu3 %v1274_v3  ;;  %v1272_v11 = vld [vmem:[#allocation6 + $0xe8] sm:$0xff]  ;;  %v1247_v12 = vld [vmem:[#allocation6 + $0x20] sm:$0xff]  ;;  %v1246_v16 = vld [vmem:[#allocation6 + $0x18] sm:$0xff] }
  0x18   :  { %623 = vmatpush.bf16.msra.mxu0 %v1249_v4  ;;  %v1255_v13 = vld [vmem:[#allocation6 + $0x60] sm:$0xff]  ;;  %v1254_v17 = vld [vmem:[#allocation6 + $0x58] sm:$0xff]  ;;  %v1245_v20 = vld [vmem:[#allocation6 + $0x10] sm:$0xff] }
  0x19   :  { %636 = vmatpush.bf16.msra.mxu1 %v1257_v5  ;;  %v1263_v14 = vld [vmem:[#allocation6 + $0xa0] sm:$0xff]  ;;  %v1262_v18 = vld [vmem:[#allocation6 + $0x98] sm:$0xff]  ;;  %v1253_v21 = vld [vmem:[#allocation6 + $0x50] sm:$0xff] }
  0x1a   :  { %649 = vmatpush.bf16.msra.mxu2 %v1265_v6  ;;  %v1271_v15 = vld [vmem:[#allocation6 + $0xe0] sm:$0xff]  ;;  %v1270_v19 = vld [vmem:[#allocation6 + $0xd8] sm:$0xff]  ;;  %v1261_v22 = vld [vmem:[#allocation6 + $0x90] sm:$0xff] }
  0x1b   :  { %662 = vmatpush.bf16.msra.mxu3 %v1273_v7  ;;  %v1269_v23 = vld [vmem:[#allocation6 + $0xd0] sm:$0xff]  ;;  %v1244_v24 = vld [vmem:[#allocation6 + $0x8] sm:$0xff]  ;;  %v1243_v28 = vld [vmem:[#allocation6] sm:$0xff] }
  0x1c   :  { %624 = vmatpush.bf16.msra.mxu0 %v1248_v8  ;;  %v1252_v25 = vld [vmem:[#allocation6 + $0x48] sm:$0xff]  ;;  %v1251_v29 = vld [vmem:[#allocation6 + $0x40] sm:$0xff]  ;;  %v1282_v32 = vld [vmem:[#allocation6 + $0x138] sm:$0xff] }
  0x1d   :  { %637 = vmatpush.bf16.msra.mxu1 %v1256_v9  ;;  %v1260_v26 = vld [vmem:[#allocation6 + $0x88] sm:$0xff]  ;;  %v1259_v30 = vld [vmem:[#allocation6 + $0x80] sm:$0xff]  ;;  %v224_v33 = vld [vmem:[#allocation3 + $0x10] sm:$0xff] }
  0x1e   :  { %650 = vmatpush.bf16.msra.mxu2 %v1264_v10  ;;  %v1268_v27 = vld [vmem:[#allocation6 + $0xc8] sm:$0xff]  ;;  %v1267_v31 = vld [vmem:[#allocation6 + $0xc0] sm:$0xff]  ;;  %v1290_v35 = vld [vmem:[#allocation6 + $0x178] sm:$0xff]  ;;  %v232_v40 = vpack.c.bf16 %v224_v33, %v224_v33 }
  0x1f   :  { %663 = vmatpush.bf16.msra.mxu3 %v1272_v11  ;;  %v222_v34 = vld [vmem:[#allocation3] sm:$0xff]  ;;  %v225_v36 = vld [vmem:[#allocation3 + $0x18] sm:$0xff]  ;;  %v223_v37 = vld [vmem:[#allocation3 + $0x8] sm:$0xff] }
  0x20   :  { %625 = vmatpush.bf16.msra.mxu0 %v1247_v12  ;;  %v1298_v38 = vld [vmem:[#allocation6 + $0x1b8] sm:$0xff]  ;;  %v230_v41 = vpack.c.bf16 %v222_v34, %v222_v34  ;;  %v233_v42 = vpack.c.bf16 %v225_v36, %v225_v36  ;;  %v231_v43 = vpack.c.bf16 %v223_v37, %v223_v37  ;;  %v1281_v44 = vld [vmem:[#allocation6 + $0x130] sm:$0xff]  ;;  %v1280_v48 = vld [vmem:[#allocation6 + $0x128] sm:$0xff] }
  0x21   :  { %638 = vmatpush.bf16.msra.mxu1 %v1255_v13  ;;  %v1306_v39 = vld [vmem:[#allocation6 + $0x1f8] sm:$0xff]  ;;  %v1289_v45 = vld [vmem:[#allocation6 + $0x170] sm:$0xff]  ;;  %v1288_v49 = vld [vmem:[#allocation6 + $0x168] sm:$0xff] }
  0x22   :  { %651 = vmatpush.bf16.msra.mxu2 %v1263_v14  ;;  %v1297_v46 = vld [vmem:[#allocation6 + $0x1b0] sm:$0xff]  ;;  %v1296_v50 = vld [vmem:[#allocation6 + $0x1a8] sm:$0xff]  ;;  %v1279_v52 = vld [vmem:[#allocation6 + $0x120] sm:$0xff] }
  0x23   :  { %664 = vmatpush.bf16.msra.mxu3 %v1271_v15  ;;  %v1305_v47 = vld [vmem:[#allocation6 + $0x1f0] sm:$0xff]  ;;  %v1304_v51 = vld [vmem:[#allocation6 + $0x1e8] sm:$0xff]  ;;  %v1287_v53 = vld [vmem:[#allocation6 + $0x160] sm:$0xff] }
  0x24   :  { %626 = vmatpush.bf16.msra.mxu0 %v1246_v16  ;;  %v1295_v54 = vld [vmem:[#allocation6 + $0x1a0] sm:$0xff]  ;;  %v1278_v56 = vld [vmem:[#allocation6 + $0x118] sm:$0xff]  ;;  %v1277_v60 = vld [vmem:[#allocation6 + $0x110] sm:$0xff] }
  0x25   :  { %639 = vmatpush.bf16.msra.mxu1 %v1254_v17  ;;  %v1303_v55 = vld [vmem:[#allocation6 + $0x1e0] sm:$0xff]  ;;  %v1286_v57 = vld [vmem:[#allocation6 + $0x158] sm:$0xff]  ;;  %v1285_v61 = vld [vmem:[#allocation6 + $0x150] sm:$0xff] }
  0x26   :  { %652 = vmatpush.bf16.msra.mxu2 %v1262_v18  ;;  %v1294_v58 = vld [vmem:[#allocation6 + $0x198] sm:$0xff]  ;;  %v1293_v62 = vld [vmem:[#allocation6 + $0x190] sm:$0xff]  ;;  %v1276_v0 = vld [vmem:[#allocation6 + $0x108] sm:$0xff] }
  0x27   :  { %665 = vmatpush.bf16.msra.mxu3 %v1270_v19  ;;  %v1302_v59 = vld [vmem:[#allocation6 + $0x1d8] sm:$0xff]  ;;  %v1301_v63 = vld [vmem:[#allocation6 + $0x1d0] sm:$0xff]  ;;  %v1284_v1 = vld [vmem:[#allocation6 + $0x148] sm:$0xff] }
  0x28   :  { %627 = vmatpush.bf16.msra.mxu0 %v1245_v20  ;;  %v1292_v2 = vld [vmem:[#allocation6 + $0x188] sm:$0xff]  ;;  %v1275_v4 = vld [vmem:[#allocation6 + $0x100] sm:$0xff]  ;;  %v228_v10 = vld [vmem:[#allocation3 + $0x30] sm:$0xff] }
  0x29   :  { %640 = vmatpush.bf16.msra.mxu1 %v1253_v21  ;;  %v1300_v3 = vld [vmem:[#allocation6 + $0x1c8] sm:$0xff]  ;;  %v1283_v5 = vld [vmem:[#allocation6 + $0x140] sm:$0xff]  ;;  %v229_v11 = vld [vmem:[#allocation3 + $0x38] sm:$0xff]  ;;  %v236_v14 = vpack.c.bf16 %v228_v10, %v228_v10 }
  0x2a   :  { %653 = vmatpush.bf16.msra.mxu2 %v1261_v22  ;;  %v1291_v6 = vld [vmem:[#allocation6 + $0x180] sm:$0xff]  ;;  %v227_v8 = vld [vmem:[#allocation3 + $0x28] sm:$0xff]  ;;  %v237_v15 = vpack.c.bf16 %v229_v11, %v229_v11  ;;  %v1314_v16 = vld [vmem:[#allocation8 + $0x38] sm:$0xff] }
  0x2b   :  { %666 = vmatpush.bf16.msra.mxu3 %v1269_v23  ;;  %v226_v7 = vld [vmem:[#allocation3 + $0x20] sm:$0xff]  ;;  %v235_v13 = vpack.c.bf16 %v227_v8, %v227_v8  ;;  %v1313_v17 = vld [vmem:[#allocation8 + $0x30] sm:$0xff]  ;;  %v1312_v18 = vld [vmem:[#allocation8 + $0x28] sm:$0xff] }
  0x2c   :  { %628 = vmatpush.bf16.msra.mxu0 %v1244_v24  ;;  %v1299_v9 = vld [vmem:[#allocation6 + $0x1c0] sm:$0xff]  ;;  %v234_v12 = vpack.c.bf16 %v226_v7, %v226_v7  ;;  %v1310_v20 = vld [vmem:[#allocation8 + $0x18] sm:$0xff]  ;;  %v1309_v23 = vld [vmem:[#allocation8 + $0x10] sm:$0xff] }
  0x2d   :  { %641 = vmatpush.bf16.msra.mxu1 %v1252_v25  ;;  %v1311_v19 = vld [vmem:[#allocation8 + $0x20] sm:$0xff]  ;;  %v1308_v25 = vld [vmem:[#allocation8 + $0x8] sm:$0xff]  ;;  %v1321_v33 = vld [vmem:[#allocation9 + $0x30] sm:$0xff] }
  0x2e   :  { %654 = vmatpush.bf16.msra.mxu2 %v1260_v26  ;;  %v1319_v37 = vld [vmem:[#allocation9 + $0x20] sm:$0xff] }
  0x2f   :  { %667 = vmatpush.bf16.msra.mxu3 %v1268_v27 }
  0x30   :  { %629 = vmatpush.bf16.msra.mxu0 %v1243_v28 }
  0x31   :  { %642 = vmatpush.bf16.msra.mxu1 %v1251_v29  ;;  %v1307_v29 = vld [vmem:[#allocation8] sm:$0xff] }
  0x32   :  { %655 = vmatpush.bf16.msra.mxu2 %v1259_v30 }
  0x33   :  { %668 = vmatpush.bf16.msra.mxu3 %v1267_v31  ;;  %630 = vmatmul.bf16.vlgmr.msra.gmra.mxu0 %v230_v41  ;;  %v1318_v41 = vld [vmem:[#allocation9 + $0x18] sm:$0xff] }
  0x34   :  { %674 = vmatpush.bf16.msrb.mxu0 %v1282_v32  ;;  %643 = vmatmul.bf16.vlgmr.msra.gmra.mxu1 %v231_v43  ;;  %v1322_v32 = vld [vmem:[#allocation9 + $0x38] sm:$0xff]  ;;  %v1317_v43 = vld [vmem:[#allocation9 + $0x10] sm:$0xff] }
  0x35   :  { %687 = vmatpush.bf16.msrb.mxu1 %v1290_v35  ;;  %656 = vmatmul.bf16.vlgmr.msra.gmra.mxu2 %v232_v40  ;;  %v1320_v35 = vld [vmem:[#allocation9 + $0x28] sm:$0xff] }
  0x36   :  { %700 = vmatpush.bf16.msrb.mxu2 %v1298_v38  ;;  %669 = vmatmul.bf16.vlgmr.msra.gmra.mxu3 %v233_v42 }
  0x37   :  { %713 = vmatpush.bf16.msrb.mxu3 %v1306_v39 }
  0x38   :  { %675 = vmatpush.bf16.msrb.mxu0 %v1281_v44 }
  0x39   :  { %688 = vmatpush.bf16.msrb.mxu1 %v1289_v45 }
  0x3a   :  { %701 = vmatpush.bf16.msrb.mxu2 %v1297_v46 }
  0x3b   :  { %714 = vmatpush.bf16.msrb.mxu3 %v1305_v47 }
  0x3c   :  { %676 = vmatpush.bf16.msrb.mxu0 %v1280_v48  ;;  %v1330_v48 = vld [vmem:[%s1534_s2] ss:$0 sm:$0xff] }
  0x3d   :  { %689 = vmatpush.bf16.msrb.mxu1 %v1288_v49 }
  0x3e   :  { %702 = vmatpush.bf16.msrb.mxu2 %v1296_v50 }
  0x3f   :  { %715 = vmatpush.bf16.msrb.mxu3 %v1304_v51 }
  0x40   :  { %677 = vmatpush.bf16.msrb.mxu0 %v1279_v52 }
  0x41   :  { %690 = vmatpush.bf16.msrb.mxu1 %v1287_v53 }
  0x42   :  { %703 = vmatpush.bf16.msrb.mxu2 %v1295_v54 }
  0x43   :  { %716 = vmatpush.bf16.msrb.mxu3 %v1303_v55 }
  0x44   :  { %678 = vmatpush.bf16.msrb.mxu0 %v1278_v56 }
  0x45   :  { %691 = vmatpush.bf16.msrb.mxu1 %v1286_v57  ;;  %v1316_v57 = vld [vmem:[#allocation9 + $0x8] sm:$0xff] }
  0x46   :  { %704 = vmatpush.bf16.msrb.mxu2 %v1294_v58  ;;  %v1315_v58 = vld [vmem:[#allocation9] sm:$0xff] }
  0x47   :  { %717 = vmatpush.bf16.msrb.mxu3 %v1302_v59  ;;  %v1331_v59 = vld [vmem:[%s1536_s4] ss:$0 sm:$0xff] }
  0x48   :  { %679 = vmatpush.bf16.msrb.mxu0 %v1277_v60 }
  0x49   :  { %692 = vmatpush.bf16.msrb.mxu1 %v1285_v61 }
  0x4a   :  { %705 = vmatpush.bf16.msrb.mxu2 %v1293_v62 }
  0x4b   :  { %718 = vmatpush.bf16.msrb.mxu3 %v1301_v63 }
  0x4c   :  { %680 = vmatpush.bf16.msrb.mxu0 %v1276_v0 }
  0x4d   :  { %693 = vmatpush.bf16.msrb.mxu1 %v1284_v1  ;;  %v1332_v1 = vld [vmem:[%s1538_s6] ss:$0 sm:$0xff] }
  0x4e   :  { %706 = vmatpush.bf16.msrb.mxu2 %v1292_v2 }
  0x4f   :  { %719 = vmatpush.bf16.msrb.mxu3 %v1300_v3 }
  0x50   :  { %681 = vmatpush.bf16.msrb.mxu0 %v1275_v4 }
  0x51   :  { %694 = vmatpush.bf16.msrb.mxu1 %v1283_v5 }
  0x52   :  { %707 = vmatpush.bf16.msrb.mxu2 %v1291_v6 }
  0x53   :  { %720 = vmatpush.bf16.msrb.mxu3 %v1299_v9  ;;  %682 = vmatmul.bf16.vlgmr.msrb.gmra.mxu0 %v234_v12 }
  0x54   :  { %695 = vmatmul.bf16.vlgmr.msrb.gmra.mxu1 %v235_v13  ;;  %823 = vmatpush.bf16.msra.mxu0 %v1314_v16 }
  0x55   :  { %708 = vmatmul.bf16.vlgmr.msrb.gmra.mxu2 %v236_v14  ;;  %890 = vmatpush.bf16.msra.mxu1 %v1322_v32 }
  0x56   :  { %721 = vmatmul.bf16.vlgmr.msrb.gmra.mxu3 %v237_v15 }
  0x58   :  { %824 = vmatpush.bf16.msra.mxu0 %v1313_v17 }
  0x59   :  { %891 = vmatpush.bf16.msra.mxu1 %v1321_v33 }
  0x5c   :  { %825 = vmatpush.bf16.msra.mxu0 %v1312_v18 }
  0x5d   :  { %892 = vmatpush.bf16.msra.mxu1 %v1320_v35 }
  0x60   :  { %826 = vmatpush.bf16.msra.mxu0 %v1311_v19 }
  0x61   :  { %893 = vmatpush.bf16.msra.mxu1 %v1319_v37 }
  0x64   :  { %827 = vmatpush.bf16.msra.mxu0 %v1310_v20 }
  0x65   :  { %894 = vmatpush.bf16.msra.mxu1 %v1318_v41 }
  0x68   :  { %828 = vmatpush.bf16.msra.mxu0 %v1309_v23 }
  0x69   :  { %895 = vmatpush.bf16.msra.mxu1 %v1317_v43 }
  0x6c   :  { %829 = vmatpush.bf16.msra.mxu0 %v1308_v25 }
  0x6d   :  { %896 = vmatpush.bf16.msra.mxu1 %v1316_v57 }
  0x70   :  { %830 = vmatpush.bf16.msra.mxu0 %v1307_v29 }
  0x71   :  { %897 = vmatpush.bf16.msra.mxu1 %v1315_v58 }
  0xb0   :  { %v631_v21 = vpop.f32.mrf.mxu0 }
  0xb1   :  { %v644_v22 = vpop.f32.mrf.mxu1 }
  0xb2   :  { %v645_v34 = vadd.f32 %v644_v22, %v631_v21 }
  0xb8   :  { %v657_v24 = vpop.f32.mrf.mxu2  ;;  %v633_v27 = vpop.f32.mrf.mxu0 }
  0xb9   :  { %v670_v26 = vpop.f32.mrf.mxu3  ;;  %v646_v28 = vpop.f32.mrf.mxu1  ;;  %v658_v36 = vadd.f32 %v657_v24, %v645_v34 }
  0xbb   :  { %v671_v38 = vadd.f32 %v670_v26, %v658_v36 }
  0xc0   :  { %v659_v30 = vpop.f32.mrf.mxu2 }
  0xc1   :  { %v672_v31 = vpop.f32.mrf.mxu3 }
  0xd0   :  { %v683_v39 = vpop.f32.mrf.mxu0 }
  0xd1   :  { %v696_v40 = vpop.f32.mrf.mxu1  ;;  %v684_v42 = vadd.f32 %v683_v39, %v671_v38 }
  0xd3   :  { %v697_v44 = vadd.f32 %v696_v40, %v684_v42 }
  0xd8   :  { %v709_v45 = vpop.f32.mrf.mxu2  ;;  %v685_v49 = vpop.f32.mrf.mxu0 }
  0xd9   :  { %v722_v46 = vpop.f32.mrf.mxu3  ;;  %v710_v47 = vadd.f32 %v709_v45, %v697_v44  ;;  %v698_v50 = vpop.f32.mrf.mxu1 }
  0xdb   :  { %v723_v51 = vadd.f32 %v722_v46, %v710_v47 }
  0xdd   :  { %v768_v52 = vadd.f32 %v1330_v48, %v723_v51 }
  0xdf   :  { %v769_v53 = vmax.f32 %v768_v52, 0.0 }
  0xe0   :  { %v711_v54 = vpop.f32.mrf.mxu2 }
  0xe1   :  { %v724_v55 = vpop.f32.mrf.mxu3  ;;  %v770_v56 = vpack.c.bf16 %v769_v53, %v769_v53 }
  0xe3   :  { %831 = vmatmul.bf16.vlgmr.msra.gmra.mxu0 %v770_v56 }
 0x160   :  { %v832_v60 = vpop.f32.mrf.mxu0 }
 0x161   :  { %v833_v61 = vadd.f32 %v1331_v59, %v832_v60 }
 0x163   :  { %v836_v62 = vmax.f32 %v833_v61, 0.0 }
 0x165   :  { %v837_v63 = vpack.c.bf16 %v836_v62, %v836_v62 }
 0x167   :  { %898 = vmatmul.bf16.vlgmr.msra.gmra.mxu1 %v837_v63 }
 0x168   :  { %v834_v0 = vpop.f32.mrf.mxu0 }
 0x1e4   :  { %v899_v2 = vpop.f32.mrf.mxu1 }
 0x1e5   :  { %v900_v3 = vadd.f32 %v1332_v1, %v899_v2 }
 0x1e7   :  { %903 = vst [vmem:[#allocation11] sm:$0xff] %v900_v3 }
 0x1e8   :  { %914 = dma.vmem_to_hbm [thread:$0]  %s910_s25, 128, %s912_s28, [#allocation5]  }
 0x1ec   :  { %v901_v4 = vpop.f32.mrf.mxu1 }
 0x1ed   :  { %1459 = dma.done.wait [#allocation5], 128  }
 0x1ee   :  { %1460 = vsyncadd [#allocation5], 4294967168 }
 0x1ef   :  { %919 = vsyncpa [#allocation4], 1 }
 0x1f0   :  { %920 = vsyncpa [#allocation7], 1 }
 0x1f1   :  { %921 = vsyncpa [#allocation10], 1 }
 0x1f2   :  { %922 = vsyncpa [#allocation5], 1 }

// kernel: tpu_custom_call.1
= control target key start
LH: loop header
LB: loop body
LE: loop exit
PB: predicated region body
PF: predicated region fallthrough
CT: control target
= control target key end

     0   :  { %12 = vsyncpa [#allocation4], 0  ;;  %s1532_s0 = inlined_call_operand.hbm [shape: f32[8,1024], index: 0, kind: input, shape index: {}]   ;;  %s1533_s1 = inlined_call_operand.hbm [shape: bf16[1024,128], index: 1, kind: input, shape index: {}]   ;;  %s1534_s2 = inlined_call_operand.vmem [shape: f32[1,128], index: 2, kind: input, shape index: {}]   ;;  %s1535_s3 = inlined_call_operand.hbm [shape: bf16[128,128], index: 3, kind: input, shape index: {}]   ;;  %s1536_s4 = inlined_call_operand.vmem [shape: f32[1,128], index: 4, kind: input, shape index: {}]   ;;  %s1537_s5 = inlined_call_operand.hbm [shape: bf16[128,128], index: 5, kind: input, shape index: {}]   ;;  %s1538_s6 = inlined_call_operand.vmem [shape: f32[1,128], index: 6, kind: input, shape index: {}]   ;;  %s1539_s7 = inlined_call_operand.hbm [shape: f32[8,128], index: 7, kind: output, shape index: {}]  }
   0x1   :  { %13 = vsyncpa [#allocation7], 0 }
   0x2   :  { %14 = vsyncpa [#allocation10], 0  ;;  %s31_s26 = sshll.u32 %s1533_s1, 4  ;;  %s32_s26 = int_to_ptr.hbm [resolvable:$true] %s31_s26 }
   0x3   :  { %15 = vsyncpa [#allocation5], 0  ;;  %s1461_s27 = smov [#allocation6]   ;;  %s21_s8 = sshll.u32 %s1532_s0, 4  ;;  %s22_s8 = int_to_ptr.hbm [resolvable:$true] %s21_s8 }
   0x4   :  { %s33_s28 = sshll.u32 %s1461_s27, 4  ;;  %s1462_s9 = smov 64   ;;  %s34_s28 = int_to_ptr.vmem [resolvable:$true] %s33_s28 }
   0x5   :  { %s1463_s10 = smov 4   ;;  %s1464_s11 = smov [#allocation3]  }
   0x6   :  { %39 = dma.hbm_to_vmem [thread:$0]  %s32_s26, 8192, %s34_s28, [#allocation7], %s1462_s9, %s1462_s9, %s1463_s10  }
   0x7   :  { %s23_s12 = sshll.u32 %s1464_s11, 4  ;;  %s46_s15 = sshll.u32 %s1535_s3, 4  ;;  %s24_s12 = int_to_ptr.vmem [resolvable:$true] %s23_s12  ;;  %s47_s15 = int_to_ptr.hbm [resolvable:$true] %s46_s15 }
   0x8   :  { %26 = dma.hbm_to_vmem [thread:$0]  %s22_s8, 1024, %s24_s12, [#allocation4]  }
   0x9   :  { %s61_s17 = sshll.u32 %s1537_s5, 4  ;;  %s1465_s18 = smov [#allocation8]   ;;  %s62_s17 = int_to_ptr.hbm [resolvable:$true] %s61_s17 }
   0xa   :  { %s48_s19 = sshll.u32 %s1465_s18, 4  ;;  %s1466_s0 = smov [#allocation9]   ;;  %s49_s19 = int_to_ptr.vmem [resolvable:$true] %s48_s19 }
   0xb   :  { %54 = dma.hbm_to_vmem [thread:$0]  %s47_s15, 1024, %s49_s19, [#allocation7], %s1462_s9, %s1462_s9, %s1463_s10  }
   0xc   :  { %s63_s20 = sshll.u32 %s1466_s0, 4  ;;  %s64_s20 = int_to_ptr.vmem [resolvable:$true] %s63_s20 }
   0xd   :  { %69 = dma.hbm_to_vmem [thread:$0]  %s62_s17, 1024, %s64_s20, [#allocation10], %s1462_s9, %s1462_s9, %s1463_s10  }
   0xe   :  { %1453 = dma.done.wait [#allocation4], 1024  }
   0xf   :  { %1454 = vsyncadd [#allocation4], 4294966272 }
  0x10   :  { %1455 = dma.done.wait [#allocation7], 9216  }
  0x11   :  { %1456 = vsyncadd [#allocation7], 4294958080 }
  0x12   :  { %1457 = dma.done.wait [#allocation10], 1024  }
  0x13   :  { %1458 = vsyncadd [#allocation10], 4294966272  ;;  %v1250_v0 = vld [vmem:[#allocation6 + $0x38] sm:$0xff]  ;;  %v1249_v4 = vld [vmem:[#allocation6 + $0x30] sm:$0xff]  ;;  %s1467_s24 = smov [#allocation11]   ;;  %s911_s28 = sshll.u32 %s1539_s7, 4  ;;  %s912_s28 = int_to_ptr.hbm [resolvable:$true] %s911_s28 }
  0x14   :  { %v1258_v1 = vld [vmem:[#allocation6 + $0x78] sm:$0xff]  ;;  %622 = vmatpush.bf16.msra.mxu0 %v1250_v0  ;;  %v1257_v5 = vld [vmem:[#allocation6 + $0x70] sm:$0xff]  ;;  %v1248_v8 = vld [vmem:[#allocation6 + $0x28] sm:$0xff]  ;;  %s909_s25 = sshll.u32 %s1467_s24, 4  ;;  %s910_s25 = int_to_ptr.vmem [resolvable:$true] %s909_s25 }
  0x15   :  { %v1266_v2 = vld [vmem:[#allocation6 + $0xb8] sm:$0xff]  ;;  %635 = vmatpush.bf16.msra.mxu1 %v1258_v1  ;;  %v1265_v6 = vld [vmem:[#allocation6 + $0xb0] sm:$0xff]  ;;  %v1256_v9 = vld [vmem:[#allocation6 + $0x68] sm:$0xff] }
  0x16   :  { %v1274_v3 = vld [vmem:[#allocation6 + $0xf8] sm:$0xff]  ;;  %648 = vmatpush.bf16.msra.mxu2 %v1266_v2  ;;  %v1273_v7 = vld [vmem:[#allocation6 + $0xf0] sm:$0xff]  ;;  %v1264_v10 = vld [vmem:[#allocation6 + $0xa8] sm:$0xff] }
  0x17   :  { %661 = vmatpush.bf16.msra.mxu3 %v1274_v3  ;;  %v1272_v11 = vld [vmem:[#allocation6 + $0xe8] sm:$0xff]  ;;  %v1247_v12 = vld [vmem:[#allocation6 + $0x20] sm:$0xff]  ;;  %v1246_v16 = vld [vmem:[#allocation6 + $0x18] sm:$0xff] }
  0x18   :  { %623 = vmatpush.bf16.msra.mxu0 %v1249_v4  ;;  %v1255_v13 = vld [vmem:[#allocation6 + $0x60] sm:$0xff]  ;;  %v1254_v17 = vld [vmem:[#allocation6 + $0x58] sm:$0xff]  ;;  %v1245_v20 = vld [vmem:[#allocation6 + $0x10] sm:$0xff] }
  0x19   :  { %636 = vmatpush.bf16.msra.mxu1 %v1257_v5  ;;  %v1263_v14 = vld [vmem:[#allocation6 + $0xa0] sm:$0xff]  ;;  %v1262_v18 = vld [vmem:[#allocation6 + $0x98] sm:$0xff]  ;;  %v1253_v21 = vld [vmem:[#allocation6 + $0x50] sm:$0xff] }
  0x1a   :  { %649 = vmatpush.bf16.msra.mxu2 %v1265_v6  ;;  %v1271_v15 = vld [vmem:[#allocation6 + $0xe0] sm:$0xff]  ;;  %v1270_v19 = vld [vmem:[#allocation6 + $0xd8] sm:$0xff]  ;;  %v1261_v22 = vld [vmem:[#allocation6 + $0x90] sm:$0xff] }
  0x1b   :  { %662 = vmatpush.bf16.msra.mxu3 %v1273_v7  ;;  %v1269_v23 = vld [vmem:[#allocation6 + $0xd0] sm:$0xff]  ;;  %v1244_v24 = vld [vmem:[#allocation6 + $0x8] sm:$0xff]  ;;  %v1243_v28 = vld [vmem:[#allocation6] sm:$0xff] }
  0x1c   :  { %624 = vmatpush.bf16.msra.mxu0 %v1248_v8  ;;  %v1252_v25 = vld [vmem:[#allocation6 + $0x48] sm:$0xff]  ;;  %v1251_v29 = vld [vmem:[#allocation6 + $0x40] sm:$0xff]  ;;  %v1282_v32 = vld [vmem:[#allocation6 + $0x138] sm:$0xff] }
  0x1d   :  { %637 = vmatpush.bf16.msra.mxu1 %v1256_v9  ;;  %v1260_v26 = vld [vmem:[#allocation6 + $0x88] sm:$0xff]  ;;  %v1259_v30 = vld [vmem:[#allocation6 + $0x80] sm:$0xff]  ;;  %v224_v33 = vld [vmem:[#allocation3 + $0x10] sm:$0xff] }
  0x1e   :  { %650 = vmatpush.bf16.msra.mxu2 %v1264_v10  ;;  %v1268_v27 = vld [vmem:[#allocation6 + $0xc8] sm:$0xff]  ;;  %v1267_v31 = vld [vmem:[#allocation6 + $0xc0] sm:$0xff]  ;;  %v1290_v35 = vld [vmem:[#allocation6 + $0x178] sm:$0xff]  ;;  %v232_v40 = vpack.c.bf16 %v224_v33, %v224_v33 }
  0x1f   :  { %663 = vmatpush.bf16.msra.mxu3 %v1272_v11  ;;  %v222_v34 = vld [vmem:[#allocation3] sm:$0xff]  ;;  %v225_v36 = vld [vmem:[#allocation3 + $0x18] sm:$0xff]  ;;  %v223_v37 = vld [vmem:[#allocation3 + $0x8] sm:$0xff] }
  0x20   :  { %625 = vmatpush.bf16.msra.mxu0 %v1247_v12  ;;  %v1298_v38 = vld [vmem:[#allocation6 + $0x1b8] sm:$0xff]  ;;  %v230_v41 = vpack.c.bf16 %v222_v34, %v222_v34  ;;  %v233_v42 = vpack.c.bf16 %v225_v36, %v225_v36  ;;  %v231_v43 = vpack.c.bf16 %v223_v37, %v223_v37  ;;  %v1281_v44 = vld [vmem:[#allocation6 + $0x130] sm:$0xff]  ;;  %v1280_v48 = vld [vmem:[#allocation6 + $0x128] sm:$0xff] }
  0x21   :  { %638 = vmatpush.bf16.msra.mxu1 %v1255_v13  ;;  %v1306_v39 = vld [vmem:[#allocation6 + $0x1f8] sm:$0xff]  ;;  %v1289_v45 = vld [vmem:[#allocation6 + $0x170] sm:$0xff]  ;;  %v1288_v49 = vld [vmem:[#allocation6 + $0x168] sm:$0xff] }
  0x22   :  { %651 = vmatpush.bf16.msra.mxu2 %v1263_v14  ;;  %v1297_v46 = vld [vmem:[#allocation6 + $0x1b0] sm:$0xff]  ;;  %v1296_v50 = vld [vmem:[#allocation6 + $0x1a8] sm:$0xff]  ;;  %v1279_v52 = vld [vmem:[#allocation6 + $0x120] sm:$0xff] }
  0x23   :  { %664 = vmatpush.bf16.msra.mxu3 %v1271_v15  ;;  %v1305_v47 = vld [vmem:[#allocation6 + $0x1f0] sm:$0xff]  ;;  %v1304_v51 = vld [vmem:[#allocation6 + $0x1e8] sm:$0xff]  ;;  %v1287_v53 = vld [vmem:[#allocation6 + $0x160] sm:$0xff] }
  0x24   :  { %626 = vmatpush.bf16.msra.mxu0 %v1246_v16  ;;  %v1295_v54 = vld [vmem:[#allocation6 + $0x1a0] sm:$0xff]  ;;  %v1278_v56 = vld [vmem:[#allocation6 + $0x118] sm:$0xff]  ;;  %v1277_v60 = vld [vmem:[#allocation6 + $0x110] sm:$0xff] }
  0x25   :  { %639 = vmatpush.bf16.msra.mxu1 %v1254_v17  ;;  %v1303_v55 = vld [vmem:[#allocation6 + $0x1e0] sm:$0xff]  ;;  %v1286_v57 = vld [vmem:[#allocation6 + $0x158] sm:$0xff]  ;;  %v1285_v61 = vld [vmem:[#allocation6 + $0x150] sm:$0xff] }
  0x26   :  { %652 = vmatpush.bf16.msra.mxu2 %v1262_v18  ;;  %v1294_v58 = vld [vmem:[#allocation6 + $0x198] sm:$0xff]  ;;  %v1293_v62 = vld [vmem:[#allocation6 + $0x190] sm:$0xff]  ;;  %v1276_v0 = vld [vmem:[#allocation6 + $0x108] sm:$0xff] }
  0x27   :  { %665 = vmatpush.bf16.msra.mxu3 %v1270_v19  ;;  %v1302_v59 = vld [vmem:[#allocation6 + $0x1d8] sm:$0xff]  ;;  %v1301_v63 = vld [vmem:[#allocation6 + $0x1d0] sm:$0xff]  ;;  %v1284_v1 = vld [vmem:[#allocation6 + $0x148] sm:$0xff] }
  0x28   :  { %627 = vmatpush.bf16.msra.mxu0 %v1245_v20  ;;  %v1292_v2 = vld [vmem:[#allocation6 + $0x188] sm:$0xff]  ;;  %v1275_v4 = vld [vmem:[#allocation6 + $0x100] sm:$0xff]  ;;  %v228_v10 = vld [vmem:[#allocation3 + $0x30] sm:$0xff] }
  0x29   :  { %640 = vmatpush.bf16.msra.mxu1 %v1253_v21  ;;  %v1300_v3 = vld [vmem:[#allocation6 + $0x1c8] sm:$0xff]  ;;  %v1283_v5 = vld [vmem:[#allocation6 + $0x140] sm:$0xff]  ;;  %v229_v11 = vld [vmem:[#allocation3 + $0x38] sm:$0xff]  ;;  %v236_v14 = vpack.c.bf16 %v228_v10, %v228_v10 }
  0x2a   :  { %653 = vmatpush.bf16.msra.mxu2 %v1261_v22  ;;  %v1291_v6 = vld [vmem:[#allocation6 + $0x180] sm:$0xff]  ;;  %v227_v8 = vld [vmem:[#allocation3 + $0x28] sm:$0xff]  ;;  %v237_v15 = vpack.c.bf16 %v229_v11, %v229_v11  ;;  %v1314_v16 = vld [vmem:[#allocation8 + $0x38] sm:$0xff] }
  0x2b   :  { %666 = vmatpush.bf16.msra.mxu3 %v1269_v23  ;;  %v226_v7 = vld [vmem:[#allocation3 + $0x20] sm:$0xff]  ;;  %v235_v13 = vpack.c.bf16 %v227_v8, %v227_v8  ;;  %v1313_v17 = vld [vmem:[#allocation8 + $0x30] sm:$0xff]  ;;  %v1312_v18 = vld [vmem:[#allocation8 + $0x28] sm:$0xff] }
  0x2c   :  { %628 = vmatpush.bf16.msra.mxu0 %v1244_v24  ;;  %v1299_v9 = vld [vmem:[#allocation6 + $0x1c0] sm:$0xff]  ;;  %v234_v12 = vpack.c.bf16 %v226_v7, %v226_v7  ;;  %v1310_v20 = vld [vmem:[#allocation8 + $0x18] sm:$0xff]  ;;  %v1309_v23 = vld [vmem:[#allocation8 + $0x10] sm:$0xff] }
  0x2d   :  { %641 = vmatpush.bf16.msra.mxu1 %v1252_v25  ;;  %v1311_v19 = vld [vmem:[#allocation8 + $0x20] sm:$0xff]  ;;  %v1308_v25 = vld [vmem:[#allocation8 + $0x8] sm:$0xff]  ;;  %v1321_v33 = vld [vmem:[#allocation9 + $0x30] sm:$0xff] }
  0x2e   :  { %654 = vmatpush.bf16.msra.mxu2 %v1260_v26  ;;  %v1319_v37 = vld [vmem:[#allocation9 + $0x20] sm:$0xff] }
  0x2f   :  { %667 = vmatpush.bf16.msra.mxu3 %v1268_v27 }
  0x30   :  { %629 = vmatpush.bf16.msra.mxu0 %v1243_v28 }
  0x31   :  { %642 = vmatpush.bf16.msra.mxu1 %v1251_v29  ;;  %v1307_v29 = vld [vmem:[#allocation8] sm:$0xff] }
  0x32   :  { %655 = vmatpush.bf16.msra.mxu2 %v1259_v30 }
  0x33   :  { %668 = vmatpush.bf16.msra.mxu3 %v1267_v31  ;;  %630 = vmatmul.bf16.vlgmr.msra.gmra.mxu0 %v230_v41  ;;  %v1318_v41 = vld [vmem:[#allocation9 + $0x18] sm:$0xff] }
  0x34   :  { %674 = vmatpush.bf16.msrb.mxu0 %v1282_v32  ;;  %643 = vmatmul.bf16.vlgmr.msra.gmra.mxu1 %v231_v43  ;;  %v1322_v32 = vld [vmem:[#allocation9 + $0x38] sm:$0xff]  ;;  %v1317_v43 = vld [vmem:[#allocation9 + $0x10] sm:$0xff] }
  0x35   :  { %687 = vmatpush.bf16.msrb.mxu1 %v1290_v35  ;;  %656 = vmatmul.bf16.vlgmr.msra.gmra.mxu2 %v232_v40  ;;  %v1320_v35 = vld [vmem:[#allocation9 + $0x28] sm:$0xff] }
  0x36   :  { %700 = vmatpush.bf16.msrb.mxu2 %v1298_v38  ;;  %669 = vmatmul.bf16.vlgmr.msra.gmra.mxu3 %v233_v42 }
  0x37   :  { %713 = vmatpush.bf16.msrb.mxu3 %v1306_v39 }
  0x38   :  { %675 = vmatpush.bf16.msrb.mxu0 %v1281_v44 }
  0x39   :  { %688 = vmatpush.bf16.msrb.mxu1 %v1289_v45 }
  0x3a   :  { %701 = vmatpush.bf16.msrb.mxu2 %v1297_v46 }
  0x3b   :  { %714 = vmatpush.bf16.msrb.mxu3 %v1305_v47 }
  0x3c   :  { %676 = vmatpush.bf16.msrb.mxu0 %v1280_v48  ;;  %v1330_v48 = vld [vmem:[%s1534_s2] ss:$0 sm:$0xff] }
  0x3d   :  { %689 = vmatpush.bf16.msrb.mxu1 %v1288_v49 }
  0x3e   :  { %702 = vmatpush.bf16.msrb.mxu2 %v1296_v50 }
  0x3f   :  { %715 = vmatpush.bf16.msrb.mxu3 %v1304_v51 }
  0x40   :  { %677 = vmatpush.bf16.msrb.mxu0 %v1279_v52 }
  0x41   :  { %690 = vmatpush.bf16.msrb.mxu1 %v1287_v53 }
  0x42   :  { %703 = vmatpush.bf16.msrb.mxu2 %v1295_v54 }
  0x43   :  { %716 = vmatpush.bf16.msrb.mxu3 %v1303_v55 }
  0x44   :  { %678 = vmatpush.bf16.msrb.mxu0 %v1278_v56 }
  0x45   :  { %691 = vmatpush.bf16.msrb.mxu1 %v1286_v57  ;;  %v1316_v57 = vld [vmem:[#allocation9 + $0x8] sm:$0xff] }
  0x46   :  { %704 = vmatpush.bf16.msrb.mxu2 %v1294_v58  ;;  %v1315_v58 = vld [vmem:[#allocation9] sm:$0xff] }
  0x47   :  { %717 = vmatpush.bf16.msrb.mxu3 %v1302_v59  ;;  %v1331_v59 = vld [vmem:[%s1536_s4] ss:$0 sm:$0xff] }
  0x48   :  { %679 = vmatpush.bf16.msrb.mxu0 %v1277_v60 }
  0x49   :  { %692 = vmatpush.bf16.msrb.mxu1 %v1285_v61 }
  0x4a   :  { %705 = vmatpush.bf16.msrb.mxu2 %v1293_v62 }
  0x4b   :  { %718 = vmatpush.bf16.msrb.mxu3 %v1301_v63 }
  0x4c   :  { %680 = vmatpush.bf16.msrb.mxu0 %v1276_v0 }
  0x4d   :  { %693 = vmatpush.bf16.msrb.mxu1 %v1284_v1  ;;  %v1332_v1 = vld [vmem:[%s1538_s6] ss:$0 sm:$0xff] }
  0x4e   :  { %706 = vmatpush.bf16.msrb.mxu2 %v1292_v2 }
  0x4f   :  { %719 = vmatpush.bf16.msrb.mxu3 %v1300_v3 }
  0x50   :  { %681 = vmatpush.bf16.msrb.mxu0 %v1275_v4 }
  0x51   :  { %694 = vmatpush.bf16.msrb.mxu1 %v1283_v5 }
  0x52   :  { %707 = vmatpush.bf16.msrb.mxu2 %v1291_v6 }
  0x53   :  { %720 = vmatpush.bf16.msrb.mxu3 %v1299_v9  ;;  %682 = vmatmul.bf16.vlgmr.msrb.gmra.mxu0 %v234_v12 }
  0x54   :  { %695 = vmatmul.bf16.vlgmr.msrb.gmra.mxu1 %v235_v13  ;;  %823 = vmatpush.bf16.msra.mxu0 %v1314_v16 }
  0x55   :  { %708 = vmatmul.bf16.vlgmr.msrb.gmra.mxu2 %v236_v14  ;;  %890 = vmatpush.bf16.msra.mxu1 %v1322_v32 }
  0x56   :  { %721 = vmatmul.bf16.vlgmr.msrb.gmra.mxu3 %v237_v15 }
  0x58   :  { %824 = vmatpush.bf16.msra.mxu0 %v1313_v17 }
  0x59   :  { %891 = vmatpush.bf16.msra.mxu1 %v1321_v33 }
  0x5c   :  { %825 = vmatpush.bf16.msra.mxu0 %v1312_v18 }
  0x5d   :  { %892 = vmatpush.bf16.msra.mxu1 %v1320_v35 }
  0x60   :  { %826 = vmatpush.bf16.msra.mxu0 %v1311_v19 }
  0x61   :  { %893 = vmatpush.bf16.msra.mxu1 %v1319_v37 }
  0x64   :  { %827 = vmatpush.bf16.msra.mxu0 %v1310_v20 }
  0x65   :  { %894 = vmatpush.bf16.msra.mxu1 %v1318_v41 }
  0x68   :  { %828 = vmatpush.bf16.msra.mxu0 %v1309_v23 }
  0x69   :  { %895 = vmatpush.bf16.msra.mxu1 %v1317_v43 }
  0x6c   :  { %829 = vmatpush.bf16.msra.mxu0 %v1308_v25 }
  0x6d   :  { %896 = vmatpush.bf16.msra.mxu1 %v1316_v57 }
  0x70   :  { %830 = vmatpush.bf16.msra.mxu0 %v1307_v29 }
  0x71   :  { %897 = vmatpush.bf16.msra.mxu1 %v1315_v58 }
  0xb0   :  { %v631_v21 = vpop.f32.mrf.mxu0 }
  0xb1   :  { %v644_v22 = vpop.f32.mrf.mxu1 }
  0xb2   :  { %v645_v34 = vadd.f32 %v644_v22, %v631_v21 }
  0xb8   :  { %v657_v24 = vpop.f32.mrf.mxu2  ;;  %v633_v27 = vpop.f32.mrf.mxu0 }
  0xb9   :  { %v670_v26 = vpop.f32.mrf.mxu3  ;;  %v646_v28 = vpop.f32.mrf.mxu1  ;;  %v658_v36 = vadd.f32 %v657_v24, %v645_v34 }
  0xbb   :  { %v671_v38 = vadd.f32 %v670_v26, %v658_v36 }
  0xc0   :  { %v659_v30 = vpop.f32.mrf.mxu2 }
  0xc1   :  { %v672_v31 = vpop.f32.mrf.mxu3 }
  0xd0   :  { %v683_v39 = vpop.f32.mrf.mxu0 }
  0xd1   :  { %v696_v40 = vpop.f32.mrf.mxu1  ;;  %v684_v42 = vadd.f32 %v683_v39, %v671_v38 }
  0xd3   :  { %v697_v44 = vadd.f32 %v696_v40, %v684_v42 }
  0xd8   :  { %v709_v45 = vpop.f32.mrf.mxu2  ;;  %v685_v49 = vpop.f32.mrf.mxu0 }
  0xd9   :  { %v722_v46 = vpop.f32.mrf.mxu3  ;;  %v710_v47 = vadd.f32 %v709_v45, %v697_v44  ;;  %v698_v50 = vpop.f32.mrf.mxu1 }
  0xdb   :  { %v723_v51 = vadd.f32 %v722_v46, %v710_v47 }
  0xdd   :  { %v768_v52 = vadd.f32 %v1330_v48, %v723_v51 }
  0xdf   :  { %v769_v53 = vmax.f32 %v768_v52, 0.0 }
  0xe0   :  { %v711_v54 = vpop.f32.mrf.mxu2 }
  0xe1   :  { %v724_v55 = vpop.f32.mrf.mxu3  ;;  %v770_v56 = vpack.c.bf16 %v769_v53, %v769_v53 }
  0xe3   :  { %831 = vmatmul.bf16.vlgmr.msra.gmra.mxu0 %v770_v56 }
 0x160   :  { %v832_v60 = vpop.f32.mrf.mxu0 }
 0x161   :  { %v833_v61 = vadd.f32 %v1331_v59, %v832_v60 }
 0x163   :  { %v836_v62 = vmax.f32 %v833_v61, 0.0 }
 0x165   :  { %v837_v63 = vpack.c.bf16 %v836_v62, %v836_v62 }
 0x167   :  { %898 = vmatmul.bf16.vlgmr.msra.gmra.mxu1 %v837_v63 }
 0x168   :  { %v834_v0 = vpop.f32.mrf.mxu0 }
 0x1e4   :  { %v899_v2 = vpop.f32.mrf.mxu1 }
 0x1e5   :  { %v900_v3 = vadd.f32 %v1332_v1, %v899_v2 }
 0x1e7   :  { %903 = vst [vmem:[#allocation11] sm:$0xff] %v900_v3 }
 0x1e8   :  { %914 = dma.vmem_to_hbm [thread:$0]  %s910_s25, 128, %s912_s28, [#allocation5]  }
 0x1ec   :  { %v901_v4 = vpop.f32.mrf.mxu1 }
 0x1ed   :  { %1459 = dma.done.wait [#allocation5], 128  }
 0x1ee   :  { %1460 = vsyncadd [#allocation5], 4294967168 }
 0x1ef   :  { %919 = vsyncpa [#allocation4], 1 }
 0x1f0   :  { %920 = vsyncpa [#allocation7], 1 }
 0x1f1   :  { %921 = vsyncpa [#allocation10], 1 }
 0x1f2   :  { %922 = vsyncpa [#allocation5], 1 }

</bundles_post_ra>
